<compile_context>
chip_gen: v7x
topology: tpu7x:2x2x1
jax: 0.10.0
libtpu: 0.0.40
codegen_flags: <defaults>
</compile_context>

<pallas_src>
import jax
import jax.numpy as jnp
from jax import lax
from jax.experimental import pallas as pl
from jax.experimental.pallas import tpu as pltpu

INPUT_SIZE = 10
HIDDEN_SIZE = 20
OUTPUT_SIZE = 5
VOCAB_SIZE = 100
LN_EPS = 1e-5

LANE = 128
HPAD = LANE        # hidden dim padded to lane width
OPAD = LANE        # output dim padded to lane width
VOCAB_PAD = LANE   # vocab padded to lane width (for the one-hot contraction)


# ---------------------------------------------------------------------------
# Kernels
# ---------------------------------------------------------------------------
def _ln_linear2(h, w2_ref, b2_ref, o_ref):
    """ReLU'd hidden -> LayerNorm(core, sum-of-squares) -> linear2' (affine folded)."""
    # Padded lanes of h are exactly zero (padded w1/table columns and b1 are 0),
    # so plain sums over all 128 lanes give the correct statistics over the
    # real HIDDEN_SIZE lanes. Two independent cross-lane reductions (XLU).
    s1 = jnp.sum(h, axis=-1, keepdims=True)
    s2 = jnp.sum(h * h, axis=-1, keepdims=True)
    mean = s1 * (1.0 / HIDDEN_SIZE)
    var = jnp.maximum(s2 * (1.0 / HIDDEN_SIZE) - mean * mean, 0.0)
    hn = (h - mean) * lax.rsqrt(var + LN_EPS)
    # Padded lanes of hn are (-mean)*rsqrt, but rows >= HIDDEN_SIZE of w2 are
    # zero, so they contribute nothing. LN gamma/beta are pre-folded into w2/b2.
    o_ref[...] = jnp.dot(hn, w2_ref[...], preferred_element_type=jnp.float32) + b2_ref[...]


def _mlp_from_x_kernel(x_ref, w1_ref, b1_ref, w2_ref, b2_ref, o_ref):
    h = jnp.dot(x_ref[...], w1_ref[...], preferred_element_type=jnp.float32) + b1_ref[...]
    h = jnp.maximum(h, 0.0)
    _ln_linear2(h, w2_ref, b2_ref, o_ref)


def _mlp_from_idx_kernel(idx_ref, tab_ref, b1_ref, w2_ref, b2_ref, o_ref):
    # Fused embedding + linear1: one-hot(idx) @ (emb @ w1) on the MXU.
    # table is (128, 128) lane/contraction aligned; a single MXU tile.
    b = idx_ref.shape[0]
    iota = lax.broadcasted_iota(jnp.int32, (b, VOCAB_PAD), 1)
    onehot = (iota == idx_ref[...]).astype(jnp.float32)
    h = jnp.dot(onehot, tab_ref[...], preferred_element_type=jnp.float32) + b1_ref[...]
    h = jnp.maximum(h, 0.0)
    _ln_linear2(h, w2_ref, b2_ref, o_ref)


# ---------------------------------------------------------------------------
# Parameter handling
# ---------------------------------------------------------------------------
def init_params(key):
    """Logical (unpadded) parameters, matching the PyTorch module."""
    k1, k2, k3, k4, k5, k6, k7 = jax.random.split(key, 7)
    return {
        # stored as (in, out) — transpose of PyTorch's (out, in)
        "w1": jax.random.normal(k1, (INPUT_SIZE, HIDDEN_SIZE), jnp.float32) * 0.1,
        "b1": jax.random.normal(k2, (HIDDEN_SIZE,), jnp.float32) * 0.1,
        "w2": jax.random.normal(k3, (HIDDEN_SIZE, OUTPUT_SIZE), jnp.float32) * 0.1,
        "b2": jax.random.normal(k4, (OUTPUT_SIZE,), jnp.float32) * 0.1,
        "emb": jax.random.normal(k5, (VOCAB_SIZE, INPUT_SIZE), jnp.float32) * 0.1,
        # non-trivial affine so the fold into w2/b2 is actually exercised
        "ln_gamma": 1.0 + 0.1 * jax.random.normal(k6, (HIDDEN_SIZE,), jnp.float32),
        "ln_beta": 0.1 * jax.random.normal(k7, (HIDDEN_SIZE,), jnp.float32),
    }


def prepare_kernel_params(params):
    """Pad feature dims to lane width, fold LN affine into linear2, and fold
    linear1 into the embedding table for the idx path."""
    w1p = jnp.zeros((INPUT_SIZE, HPAD), jnp.float32).at[:, :HIDDEN_SIZE].set(params["w1"])
    b1p = jnp.zeros((1, HPAD), jnp.float32).at[0, :HIDDEN_SIZE].set(params["b1"])

    w2_folded = params["ln_gamma"][:, None] * params["w2"]            # (H, O)
    b2_folded = params["ln_beta"] @ params["w2"] + params["b2"]       # (O,)
    w2p = jnp.zeros((HPAD, OPAD), jnp.float32).at[:HIDDEN_SIZE, :OUTPUT_SIZE].set(w2_folded)
    b2p = jnp.zeros((1, OPAD), jnp.float32).at[0, :OUTPUT_SIZE].set(b2_folded)

    # Embedding lookup table with linear1 folded in: (VOCAB_PAD, HPAD).
    # Columns >= HIDDEN_SIZE are zero (w1p padding); rows >= VOCAB_SIZE are zero.
    table = jnp.zeros((VOCAB_PAD, HPAD), jnp.float32).at[:VOCAB_SIZE, :].set(
        params["emb"] @ w1p)

    return {"w1p": w1p, "b1p": b1p, "w2p": w2p, "b2p": b2p, "table": table}


# ---------------------------------------------------------------------------
# Forward wrappers (jitted: one dispatched program per call)
# ---------------------------------------------------------------------------
_VMEM = pl.BlockSpec(memory_space=pltpu.MemorySpace.VMEM)
_PARAM_BYTES = 4 * (HPAD + HPAD * OPAD + OPAD)


def _forward_from_x(kparams, x):
    batch = x.shape[0]
    cost = pl.CostEstimate(
        flops=2 * batch * (INPUT_SIZE * HPAD + HPAD * OPAD),
        transcendentals=batch,
        bytes_accessed=4 * (batch * INPUT_SIZE + INPUT_SIZE * HPAD + batch * OPAD)
        + _PARAM_BYTES,
    )
    out = pl.pallas_call(
        _mlp_from_x_kernel,
        out_shape=jax.ShapeDtypeStruct((batch, OPAD), jnp.float32),
        in_specs=[_VMEM] * 5,
        out_specs=_VMEM,
        cost_estimate=cost,
    )(
        x.astype(jnp.float32),
        kparams["w1p"], kparams["b1p"], kparams["w2p"], kparams["b2p"],
    )
    return out[:, :OUTPUT_SIZE]


def _forward_from_idx(kparams, idx):
    batch = idx.shape[0]
    cost = pl.CostEstimate(
        flops=2 * batch * (VOCAB_PAD * HPAD + HPAD * OPAD),
        transcendentals=batch,
        bytes_accessed=4 * (batch + VOCAB_PAD * HPAD + batch * OPAD) + _PARAM_BYTES,
    )
    out = pl.pallas_call(
        _mlp_from_idx_kernel,
        out_shape=jax.ShapeDtypeStruct((batch, OPAD), jnp.float32),
        in_specs=[_VMEM] * 5,
        out_specs=_VMEM,
        cost_estimate=cost,
    )(
        idx.reshape(batch, 1).astype(jnp.int32),
        kparams["table"], kparams["b1p"], kparams["w2p"], kparams["b2p"],
    )
    return out[:, :OUTPUT_SIZE]


forward_from_x = jax.jit(_forward_from_x)
forward_from_idx = jax.jit(_forward_from_idx)


def simple_model_forward(kparams, x=None, idx=None):
    """Forward pass matching SimpleModel.forward(x, idx); returns (B, OUTPUT_SIZE)."""
    if idx is not None:
        return forward_from_idx(kparams, idx)
    return forward_from_x(kparams, x)


# ---------------------------------------------------------------------------
# Pure-JAX reference (uses the original, unpadded/unfolded parameters)
# ---------------------------------------------------------------------------
def _reference_forward(params, x=None, idx=None):
    if idx is not None:
        x = jnp.take(params["emb"], idx, axis=0)
    h = x @ params["w1"] + params["b1"]
    h = jnp.maximum(h, 0.0)
    mean = jnp.mean(h, axis=-1, keepdims=True)
    var = jnp.mean((h - mean) ** 2, axis=-1, keepdims=True)
    hn = (h - mean) / jnp.sqrt(var + LN_EPS)
    hn = hn * params["ln_gamma"] + params["ln_beta"]
    return hn @ params["w2"] + params["b2"]


if __name__ == "__main__":
    key = jax.random.PRNGKey(0)
    pkey, xkey, ikey = jax.random.split(key, 3)

    params = init_params(pkey)
    kparams = prepare_kernel_params(params)

    batch = 8
    x = jax.random.normal(xkey, (batch, INPUT_SIZE), jnp.float32)
    idx = jax.random.randint(ikey, (batch,), 0, VOCAB_SIZE)

    # Path 1: direct features
    out_x = jax.block_until_ready(simple_model_forward(kparams, x=x))
    # Path 2: fused embedding+linear1 lookup from integer ids
    out_idx = jax.block_until_ready(simple_model_forward(kparams, idx=idx))

    ref_x = _reference_forward(params, x=x)
    ref_idx = _reference_forward(params, idx=idx)

    assert out_x.shape == (batch, OUTPUT_SIZE)
    assert out_idx.shape == (batch, OUTPUT_SIZE)
    assert jnp.allclose(out_x, ref_x, atol=2e-4, rtol=1e-3)
    assert jnp.allclose(out_idx, ref_idx, atol=2e-4, rtol=1e-3)

    print("KERNEL_OK")
</pallas_src>

<mosaic_0001>
module attributes {stable_mosaic.version = 11 : i64} {
  func.func @_mlp_from_x_kernel(%arg0: memref<8x10xf32, #tpu.memory_space<vmem>>, %arg1: memref<10x128xf32, #tpu.memory_space<vmem>>, %arg2: memref<1x128xf32, #tpu.memory_space<vmem>>, %arg3: memref<128x128xf32, #tpu.memory_space<vmem>>, %arg4: memref<1x128xf32, #tpu.memory_space<vmem>>, %arg5: memref<8x128xf32, #tpu.memory_space<vmem>>) attributes {dimension_semantics = [], scalar_prefetch = 0 : i64, scratch_operands = 0 : i64, tpu.core_type = #tpu.core_type<tc>} {
    %c0 = arith.constant 0 : index
    %c0_0 = arith.constant 0 : index
    %0 = vector.load %arg0[%c0, %c0_0] : memref<8x10xf32, #tpu.memory_space<vmem>>, vector<8x10xf32>
    %c0_1 = arith.constant 0 : index
    %c0_2 = arith.constant 0 : index
    %1 = vector.load %arg1[%c0_1, %c0_2] : memref<10x128xf32, #tpu.memory_space<vmem>>, vector<10x128xf32>
    %cst = arith.constant dense<0.000000e+00> : vector<8x128xf32>
    %2 = tpu.matmul %0, %1, %cst {dimension_numbers = #tpu.dot_dimension_numbers<[1], [0], [0], [1], [0, 0, 1, 1], [], []>} : vector<8x10xf32>, vector<10x128xf32>, vector<8x128xf32> -> vector<8x128xf32>
    %c0_3 = arith.constant 0 : index
    %c0_4 = arith.constant 0 : index
    %3 = vector.load %arg2[%c0_3, %c0_4] : memref<1x128xf32, #tpu.memory_space<vmem>>, vector<1x128xf32>
    %4 = vector.broadcast %3 : vector<1x128xf32> to vector<8x128xf32>
    %5 = arith.addf %2, %4 : vector<8x128xf32>
    %cst_5 = arith.constant 0.000000e+00 : f32
    %6 = vector.broadcast %cst_5 : f32 to vector<8x128xf32>
    %7 = arith.maximumf %5, %6 : vector<8x128xf32>
    %cst_6 = arith.constant dense<0.000000e+00> : vector<8xf32>
    %8 = vector.multi_reduction <add>, %7, %cst_6 [1] : vector<8x128xf32> to vector<8xf32>
    %9 = vector.shape_cast %8 : vector<8xf32> to vector<8x1xf32>
    %10 = arith.mulf %7, %7 : vector<8x128xf32>
    %cst_7 = arith.constant dense<0.000000e+00> : vector<8xf32>
    %11 = vector.multi_reduction <add>, %10, %cst_7 [1] : vector<8x128xf32> to vector<8xf32>
    %12 = vector.shape_cast %11 : vector<8xf32> to vector<8x1xf32>
    %cst_8 = arith.constant 5.000000e-02 : f32
    %13 = vector.broadcast %cst_8 : f32 to vector<8x1xf32>
    %14 = arith.mulf %9, %13 : vector<8x1xf32>
    %cst_9 = arith.constant 5.000000e-02 : f32
    %15 = vector.broadcast %cst_9 : f32 to vector<8x1xf32>
    %16 = arith.mulf %12, %15 : vector<8x1xf32>
    %17 = arith.mulf %14, %14 : vector<8x1xf32>
    %18 = arith.subf %16, %17 : vector<8x1xf32>
    %cst_10 = arith.constant 0.000000e+00 : f32
    %19 = vector.broadcast %cst_10 : f32 to vector<8x1xf32>
    %20 = arith.maximumf %18, %19 : vector<8x1xf32>
    %21 = vector.broadcast %14 : vector<8x1xf32> to vector<8x128xf32>
    %22 = arith.subf %7, %21 : vector<8x128xf32>
    %cst_11 = arith.constant 9.99999974E-6 : f32
    %23 = vector.broadcast %cst_11 : f32 to vector<8x1xf32>
    %24 = arith.addf %20, %23 : vector<8x1xf32>
    %25 = math.rsqrt %24 : vector<8x1xf32>
    %26 = vector.broadcast %25 : vector<8x1xf32> to vector<8x128xf32>
    %27 = arith.mulf %22, %26 : vector<8x128xf32>
    %c0_12 = arith.constant 0 : index
    %c0_13 = arith.constant 0 : index
    %28 = vector.load %arg3[%c0_12, %c0_13] : memref<128x128xf32, #tpu.memory_space<vmem>>, vector<128x128xf32>
    %cst_14 = arith.constant dense<0.000000e+00> : vector<8x128xf32>
    %29 = tpu.matmul %27, %28, %cst_14 {dimension_numbers = #tpu.dot_dimension_numbers<[1], [0], [0], [1], [0, 0, 1, 1], [], []>} : vector<8x128xf32>, vector<128x128xf32>, vector<8x128xf32> -> vector<8x128xf32>
    %c0_15 = arith.constant 0 : index
    %c0_16 = arith.constant 0 : index
    %30 = vector.load %arg4[%c0_15, %c0_16] : memref<1x128xf32, #tpu.memory_space<vmem>>, vector<1x128xf32>
    %31 = vector.broadcast %30 : vector<1x128xf32> to vector<8x128xf32>
    %32 = arith.addf %29, %31 : vector<8x128xf32>
    %c0_17 = arith.constant 0 : index
    %c0_18 = arith.constant 0 : index
    %33 = vector.load %arg5[%c0_17, %c0_18] : memref<8x128xf32, #tpu.memory_space<vmem>>, vector<8x128xf32>
    tpu.vector_store %arg5[%c0_17, %c0_18], %32 {strides = array<i32>} : memref<8x128xf32, #tpu.memory_space<vmem>>, vector<8x128xf32>,
    return
  }
}

</mosaic_0001>

<bundles_post_ra>
// kernel: _forward_from_x.1
= control target key start
LH: loop header
LB: loop body
LE: loop exit
PB: predicated region body
PF: predicated region fallthrough
CT: control target
= control target key end

     0   :  { %10 = vsyncpa [#allocation3], 0  ;;  %s574_s0 = inlined_call_operand.vmem [shape: f32[8,10], index: 0, kind: input, shape index: {}]   ;;  %s575_s1 = inlined_call_operand.hbm [shape: f32[10,128], index: 1, kind: input, shape index: {}]   ;;  %s576_s2 = inlined_call_operand.hbm [shape: f32[1,128], index: 2, kind: input, shape index: {}]   ;;  %s577_s3 = inlined_call_operand.hbm [shape: f32[128,128], index: 3, kind: input, shape index: {}]   ;;  %s578_s4 = inlined_call_operand.vmem [shape: f32[1,128], index: 4, kind: input, shape index: {}]   ;;  %s579_s5 = inlined_call_operand.hbm [shape: f32[8,128], index: 5, kind: output, shape index: {}]  }
   0x1   :  { %11 = vsyncpa [#allocation6], 0 }
   0x2   :  { %12 = vsyncpa [#allocation4], 0  ;;  %s473_s18 = smov [#allocation5]   ;;  %s474_s20 = smov [#allocation2]  }
   0x3   :  { %s33_s19 = sshll.u32 %s473_s18, 4  ;;  %s20_s21 = sshll.u32 %s474_s20, 4  ;;  %s34_s19 = int_to_ptr.vmem [resolvable:$true] %s33_s19  ;;  %s513_s21 = int_to_ptr.vmem [resolvable:$true] %s20_s21 }
   0x4   :  { %s379_s24 = scalar_lea.hbm %s576_s2, 16 }
   0x5   :  { %p380_p0 = scmp.ne.s32.totalorder %s576_s2, %s379_s24  ;;  %p383_p1 = scmp.lt.u32.totalorder %s379_s24, %s576_s2 }
   0x7   :  { %p385_p2 = pnand %p383_p1, %p380_p0 }
   0x9   :  { %388 = shalt.err (!%p385_p2)
}
   0xa   :  { %s389_s29 = scalar_lea.vmem %s34_s19, 16  ;;  %s393_s30 = scalar_lea.vmem %s34_s19, 32 }
   0xb   :  { %p390_p3 = scmp.ne.s32.totalorder %s34_s19, %s389_s29  ;;  %p394_p4 = scmp.lt.s32.totalorder %s34_s19, %s34_s19 }
   0xc   :  { %p395_p5 = scmp.lt.s32.totalorder %s393_s30, %s389_s29 }
   0xe   :  { %p396_p6 = por %p395_p5, %p394_p4 }
  0x10   :  { %p397_p7 = pnand %p396_p6, %p390_p3 }
  0x12   :  { %400 = shalt.err (!%p397_p7)
}
  0x13   :  { %36 = dma.hbm_to_vmem [thread:$0]  %s576_s2, 16, %s34_s19, [#allocation6]  }
  0x14   :  { %s401_s10 = scalar_lea.hbm %s575_s1, 256 }
  0x15   :  { %p402_p8 = scmp.ne.s32.totalorder %s575_s1, %s401_s10  ;;  %p405_p9 = scmp.lt.u32.totalorder %s401_s10, %s575_s1 }
  0x17   :  { %p407_p10 = pnand %p405_p9, %p402_p8 }
  0x19   :  { %410 = shalt.err (!%p407_p10)
}
  0x1a   :  { %s411_s15 = scalar_lea.vmem %s513_s21, 256  ;;  %p416_p12 = scmp.lt.s32.totalorder %s513_s21, %s513_s21 }
  0x1b   :  { %p412_p11 = scmp.ne.s32.totalorder %s513_s21, %s411_s15  ;;  %p417_p13 = scmp.lt.s32.totalorder %s411_s15, %s411_s15 }
  0x1d   :  { %p418_p0 = por %p417_p13, %p416_p12 }
  0x1f   :  { %p419_p1 = pnand %p418_p0, %p412_p11 }
  0x21   :  { %422 = shalt.err (!%p419_p1)
}
  0x22   :  { %s475_s2 = smov 128   ;;  %s476_s16 = smov 8  }
  0x23   :  { %26 = dma.hbm_to_vmem [thread:$0]  %s575_s1, 256, %s513_s21, [#allocation3], %s475_s2, %s475_s2, %s476_s16  }
  0x24   :  { %s477_s19 = smov [#allocation7]   ;;  %s423_s24 = scalar_lea.hbm %s577_s3, 2048 }
  0x25   :  { %s42_s20 = sshll.u32 %s477_s19, 4  ;;  %p424_p2 = scmp.ne.s32.totalorder %s577_s3, %s423_s24  ;;  %s43_s20 = int_to_ptr.vmem [resolvable:$true] %s42_s20 }
  0x26   :  { %p427_p3 = scmp.lt.u32.totalorder %s423_s24, %s577_s3 }
  0x28   :  { %p429_p4 = pnand %p427_p3, %p424_p2 }
  0x2a   :  { %432 = shalt.err (!%p429_p4)
}
  0x2b   :  { %s433_s29 = scalar_lea.vmem %s43_s20, 2048  ;;  %p438_p6 = scmp.lt.s32.totalorder %s43_s20, %s43_s20 }
  0x2c   :  { %p434_p5 = scmp.ne.s32.totalorder %s43_s20, %s433_s29  ;;  %p439_p7 = scmp.lt.s32.totalorder %s433_s29, %s433_s29 }
  0x2e   :  { %p440_p8 = por %p439_p7, %p438_p6 }
  0x30   :  { %p441_p9 = pnand %p440_p8, %p434_p5 }
  0x32   :  { %444 = shalt.err (!%p441_p9)
}
  0x33   :  { %48 = dma.hbm_to_vmem [thread:$0]  %s577_s3, 2048, %s43_s20, [#allocation6], %s475_s2, %s475_s2, %s476_s16  }
  0x34   :  { %467 = dma.done.wait [#allocation3], 256  }
  0x35   :  { %468 = vsyncadd [#allocation3], 4294967040 }
  0x36   :  { %469 = dma.done.wait [#allocation6], 2064  }
  0x37   :  { %470 = vsyncadd [#allocation6], 4294965232  ;;  %v478_v0 = vmov 0.0|0.0   ;;  %vm479_vm0 = vmmov 0   ;;  %v480_v1 = vmov 0.0   ;;  %vm74_vm1 = vcmask 1041408  }
  0x38   :  { %339 = vmatprep.subr.bf16.mxu0 %v478_v0  ;;  %343 = vmatprep.subr.bf16.mxu1 %v478_v0  ;;  %v61_v2 = vld [vmem:[#allocation2] sm:$0xff]  ;;  %v62_v3 = vld [vmem:[#allocation2 + $0x8] sm:$0x3]  ;;  %vm481_vm2 = vmmov 1   ;;  %v60_v5 = vld [vmem:[%s574_s0] sm:$0xff]  ;;  %vm70_vm4 = vcmask 80896  }
  0x39   :  { %301 = vmatprep.mubr.msk.f32.mxu0 %vm479_vm0, %v480_v1  ;;  %336 = vmatprep.mubr.msk.f32.mxu1 %vm479_vm0, %v480_v1  ;;  %vm341_vm3 = vmpackc.low %vm74_vm1, %vm481_vm2  ;;  %v340_v4 = vpack.c.bf16 %v62_v3, %v61_v2  ;;  %v163_v6 = vld [vmem:[#allocation7] sm:$0xff]  ;;  %v164_v7 = vld [vmem:[#allocation7 + $0x8] sm:$0xff]  ;;  %s482_s7 = smov [#allocation8]  }
  0x3a   :  { %v165_v8 = vld [vmem:[#allocation7 + $0x10] sm:$0xff]  ;;  %v344_v9 = vpack.c.bf16 %v164_v7, %v163_v6  ;;  %v166_v10 = vld [vmem:[#allocation7 + $0x18] sm:$0xff]  ;;  %v167_v18 = vld [vmem:[#allocation7 + $0x20] sm:$0xff]  ;;  %s263_s8 = sshll.u32 %s482_s7, 4  ;;  %s264_s8 = int_to_ptr.vmem [resolvable:$true] %s263_s8 }
  0x3b   :  { %342 = vmatpush3.bf16.msk.msra.mxu0 %vm341_vm3, %v340_v4  ;;  %v347_v11 = vpack.c.bf16 %v166_v10, %v165_v8  ;;  %v273_v12 = vld [vmem:[#allocation5] ss:$0 sm:$0xff]  ;;  %v168_v19 = vld [vmem:[#allocation7 + $0x28] sm:$0xff]  ;;  %v169_v21 = vld [vmem:[#allocation7 + $0x30] sm:$0xff]  ;;  %s445_s9 = scalar_lea.vmem %s264_s8, 128  ;;  %p450_p11 = scmp.lt.s32.totalorder %s264_s8, %s264_s8 }
  0x3c   :  { %345 = vmatpush3.bf16.msra.mxu1 %v344_v9  ;;  %v350_v20 = vpack.c.bf16 %v168_v19, %v167_v18  ;;  %v170_v22 = vld [vmem:[#allocation7 + $0x38] sm:$0xff]  ;;  %v171_v24 = vld [vmem:[#allocation7 + $0x40] sm:$0xff]  ;;  %v172_v25 = vld [vmem:[#allocation7 + $0x48] sm:$0xff]  ;;  %p446_p10 = scmp.ne.s32.totalorder %s264_s8, %s445_s9  ;;  %p451_p12 = scmp.lt.s32.totalorder %s445_s9, %s445_s9 }
  0x3d   :  { %346 = vmatprep.subr.bf16.mxu1 %v478_v0  ;;  %v353_v23 = vpack.c.bf16 %v170_v22, %v169_v21  ;;  %v356_v26 = vpack.c.bf16 %v172_v25, %v171_v24  ;;  %v173_v27 = vld [vmem:[#allocation7 + $0x50] sm:$0xff]  ;;  %v174_v28 = vld [vmem:[#allocation7 + $0x58] sm:$0xff]  ;;  %v175_v30 = vld [vmem:[#allocation7 + $0x60] sm:$0xff] }
  0x3e   :  { %302 = vmatmul.mubr.msk.f32.vlgmr.msra.gmra.mrb[0].mxu0 %vm70_vm4, %v60_v5  ;;  %v359_v29 = vpack.c.bf16 %v174_v28, %v173_v27  ;;  %v176_v31 = vld [vmem:[#allocation7 + $0x68] sm:$0xff]  ;;  %v177_v33 = vld [vmem:[#allocation7 + $0x70] sm:$0xff]  ;;  %v178_v34 = vld [vmem:[#allocation7 + $0x78] sm:$0xff]  ;;  %p452_p13 = por %p451_p12, %p450_p11 }
  0x3f   :  { %v362_v32 = vpack.c.bf16 %v176_v31, %v175_v30  ;;  %v365_v35 = vpack.c.bf16 %v178_v34, %v177_v33  ;;  %v276_v47 = vld [vmem:[%s578_s4] ss:$0 sm:$0xff] }
  0x40   :  { %348 = vmatpush3.bf16.msra.mxu1 %v347_v11  ;;  %p453_p0 = pnand %p452_p13, %p446_p10 }
  0x41   :  { %349 = vmatprep.subr.bf16.mxu1 %v478_v0 }
  0x44   :  { %351 = vmatpush3.bf16.msra.mxu1 %v350_v20 }
  0x45   :  { %352 = vmatprep.subr.bf16.mxu1 %v478_v0 }
  0x48   :  { %354 = vmatpush3.bf16.msra.mxu1 %v353_v23 }
  0x49   :  { %355 = vmatprep.subr.bf16.mxu1 %v478_v0 }
  0x4c   :  { %357 = vmatpush3.bf16.msra.mxu1 %v356_v26 }
  0x4d   :  { %358 = vmatprep.subr.bf16.mxu1 %v478_v0 }
  0x50   :  { %360 = vmatpush3.bf16.msra.mxu1 %v359_v29 }
  0x51   :  { %361 = vmatprep.subr.bf16.mxu1 %v478_v0 }
  0x54   :  { %363 = vmatpush3.bf16.msra.mxu1 %v362_v32 }
  0x55   :  { %364 = vmatprep.subr.bf16.mxu1 %v478_v0 }
  0x58   :  { %366 = vmatpush3.bf16.msra.mxu1 %v365_v35 }
 0x111   :  { %v144_v13 = vpop.f32.mrb[0].mxu0 }
 0x112   :  { %v145_v14 = vadd.f32 %v273_v12, %v144_v13  ;;  %v303_v15 = vpop.f32.mrb[1].mxu0 }
 0x114   :  { %v148_v16 = vmax.f32 %v145_v14, 0.0 }
 0x116   :  { %149 = vadd.xlane.f32.xlu0 %v148_v16  ;;  %v151_v17 = vmul.f32 %v148_v16, %v148_v16 }
 0x11a   :  { %152 = vadd.xlane.f32.xlu0 %v151_v17 }
 0x1a3   :  { %v150_v36 = vpop.xlane.xlu0 %149 }
 0x1a4   :  { %v154_v37 = vmul.f32 0.05, %v150_v36 }
 0x1a6   :  { %v156_v39 = vmul.f32 %v154_v37, %v154_v37  ;;  %v159_v44 = vsub.f32 %v148_v16, %v154_v37 }
 0x1a7   :  { %v153_v38 = vpop.xlane.xlu0 %152 }
 0x1a8   :  { %v155_v40 = vmul.f32 0.05, %v153_v38 }
 0x1aa   :  { %v157_v41 = vsub.f32 %v155_v40, %v156_v39 }
 0x1ac   :  { %v158_v42 = vmax.f32 %v157_v41, 0.0 }
 0x1ae   :  { %v160_v43 = vadd.f32 1e-05, %v158_v42 }
 0x1b0   :  { %377 = vrsqrt.f32 %v160_v43 }
 0x1ba   :  { %v378_v45 = vpop.eup %377 }
 0x1bb   :  { %v162_v46 = vmul.f32 %v378_v45, %v159_v44 }
 0x1bd   :  { %337 = vmatmul.mubr.f32.vlgmr.msra.gmra.mrb[0].mxu1 %v162_v46 }
 0x290   :  { %v252_v48 = vpop.f32.mrb[0].mxu1 }
 0x291   :  { %v253_v49 = vadd.f32 %v276_v47, %v252_v48  ;;  %v338_v50 = vpop.f32.mrb[1].mxu1 }
 0x293   :  { %256 = vst [vmem:[#allocation8] sm:$0xff] %v253_v49 }
 0x294   :  { %456 = shalt.err (!%p453_p0)
}
 0x295   :  { %s457_s12 = scalar_lea.hbm %s579_s5, 128 }
 0x296   :  { %p458_p1 = scmp.ne.s32.totalorder %s579_s5, %s457_s12  ;;  %p461_p2 = scmp.lt.u32.totalorder %s457_s12, %s579_s5 }
 0x298   :  { %p463_p3 = pnand %p461_p2, %p458_p1 }
 0x29a   :  { %466 = shalt.err (!%p463_p3)
}
 0x29b   :  { %266 = dma.vmem_to_hbm [thread:$0]  %s264_s8, 128, %s579_s5, [#allocation4]  }
 0x29c   :  { %471 = dma.done.wait [#allocation4], 128  }
 0x29d   :  { %472 = vsyncadd [#allocation4], 4294967168 }
 0x29e   :  { %270 = vsyncpa [#allocation3], 1 }
 0x29f   :  { %271 = vsyncpa [#allocation6], 1 }
 0x2a0   :  { %272 = vsyncpa [#allocation4], 1 }

</bundles_post_ra>
